<compile_context>
chip_gen: v7x
topology: tpu7x:2x2x1
jax: 0.10.0
libtpu: 0.0.40
codegen_flags: <defaults>
</compile_context>

<pallas_src>
import numpy as np
import jax
import jax.numpy as jnp
from jax.experimental import pallas as pl
from jax.experimental.pallas import tpu as pltpu

# Static network geometry implied by the PyTorch module.
KS = 5            # conv kernel size
H0 = 12           # input spatial size (12 -> 8 -> 4 with two valid 5x5 convs)
H1 = H0 - KS + 1  # 8
H2 = H1 - KS + 1  # 4
C0, C1, C2 = 1, 6, 12
F1, F2, F3 = 120, 60, 10

D0 = H0 * H0        # 144  flattened input features (C0 == 1)
D1 = C1 * H1 * H1   # 384  flattened conv1 activations (NCHW order)
D2 = C2 * H2 * H2   # 192  flattened conv2 activations (NCHW order == torch flatten)
OUT_PAD = 128       # lane-dense padded logits width (sliced to F3 in the wrapper)


# ----------------------------------------------------------------------------
# The fused kernel: five MXU matmuls, bias+ReLU epilogues, one HBM store.
# ----------------------------------------------------------------------------
def _fused_cnn_kernel(x_ref, w1_ref, b1_ref, w2_ref, b2_ref,
                      wf1_ref, bf1_ref, wf2_ref, bf2_ref, wo_ref, bo_ref,
                      out_ref):
    x = x_ref[...]                                                   # (nb, 144)

    # conv1 + ReLU  (dense im2col-folded weight matrix, (144, 384))
    h1 = jnp.maximum(
        jnp.dot(x, w1_ref[...], preferred_element_type=jnp.float32)
        + b1_ref[...], 0.0)                                          # (nb, 384)

    # conv2 + ReLU  (dense im2col-folded weight matrix, (384, 192));
    # column order == PyTorch NCHW flatten, so no activation permute is needed.
    h2 = jnp.maximum(
        jnp.dot(h1, w2_ref[...], preferred_element_type=jnp.float32)
        + b2_ref[...], 0.0)                                          # (nb, 192)

    # fc1 + ReLU — one (nb,192)x(192,120) matmul.
    a3 = jnp.maximum(
        jnp.dot(h2, wf1_ref[...], preferred_element_type=jnp.float32)
        + bf1_ref[...], 0.0)                                         # (nb, 120)

    # fc2 + ReLU
    a4 = jnp.maximum(
        jnp.dot(a3, wf2_ref[...], preferred_element_type=jnp.float32)
        + bf2_ref[...], 0.0)                                         # (nb, 60)

    # out (no ReLU) — lane-dense padded to 128 columns; the only HBM store.
    a5 = jnp.dot(a4, wo_ref[...], preferred_element_type=jnp.float32) + bo_ref[...]
    out_ref[...] = a5.astype(out_ref.dtype)                          # (nb, 128)


# ----------------------------------------------------------------------------
# pallas_call wrapper
# ----------------------------------------------------------------------------
def _pick_batch_tile(n):
    """Largest divisor tile <= 128 (multiple of 8) so big batches get a
    multi-step 'parallel' grid (pipelining + v7x megacore); tiny batches run
    as a single step."""
    for nb in (128, 64, 32, 16, 8):
        if n > nb and n % nb == 0:
            return nb
    return n


def cnn_forward_pallas(x_flat, w):
    """x_flat: (N, 144) f32 flattened input.  w: dict of pre-laid-out params."""
    n = x_flat.shape[0]
    nb = _pick_batch_tile(n)
    grid = (n // nb,)

    def full(arr):
        return pl.BlockSpec(arr.shape, lambda i: (0, 0))

    in_specs = [
        pl.BlockSpec((nb, D0), lambda i: (i, 0)),
        full(w["w1"]), full(w["b1"]),
        full(w["w2"]), full(w["b2"]),
        full(w["wf1"]), full(w["bf1"]),
        full(w["wf2"]), full(w["bf2"]),
        full(w["wo"]), full(w["bo"]),
    ]
    out_specs = pl.BlockSpec((nb, OUT_PAD), lambda i: (i, 0))

    flops_per_row = 2 * (D0 * D1 + D1 * D2 + D2 * F1 + F1 * F2 + F2 * OUT_PAD)
    weight_bytes = sum(int(np.prod(w[k].shape)) for k in w) * 4
    cost = pl.CostEstimate(
        flops=n * flops_per_row,
        transcendentals=0,
        bytes_accessed=n * (D0 + OUT_PAD) * 4 + weight_bytes,
    )

    return pl.pallas_call(
        _fused_cnn_kernel,
        out_shape=jax.ShapeDtypeStruct((n, OUT_PAD), jnp.float32),
        grid=grid,
        in_specs=in_specs,
        out_specs=out_specs,
        compiler_params=pltpu.CompilerParams(
            dimension_semantics=("parallel",)),
        cost_estimate=cost,
    )(x_flat, w["w1"], w["b1"], w["w2"], w["b2"],
      w["wf1"], w["bf1"], w["wf2"], w["bf2"], w["wo"], w["bo"])


# ----------------------------------------------------------------------------
# Parameters: PyTorch layouts at init, one-time host-side re-layout.
# ----------------------------------------------------------------------------
def init_params(seed=0):
    keys = jax.random.split(jax.random.PRNGKey(seed), 10)
    p = {}
    p["conv1_w"] = 0.1 * jax.random.normal(keys[0], (C1, C0, KS, KS), jnp.float32)
    p["conv1_b"] = 0.1 * jax.random.normal(keys[1], (C1,), jnp.float32)
    p["conv2_w"] = 0.1 * jax.random.normal(keys[2], (C2, C1, KS, KS), jnp.float32)
    p["conv2_b"] = 0.1 * jax.random.normal(keys[3], (C2,), jnp.float32)
    p["fc1_w"] = 0.1 * jax.random.normal(keys[4], (F1, D2), jnp.float32)
    p["fc1_b"] = 0.1 * jax.random.normal(keys[5], (F1,), jnp.float32)
    p["fc2_w"] = 0.1 * jax.random.normal(keys[6], (F2, F1), jnp.float32)
    p["fc2_b"] = 0.1 * jax.random.normal(keys[7], (F2,), jnp.float32)
    p["out_w"] = 0.1 * jax.random.normal(keys[8], (F3, F2), jnp.float32)
    p["out_b"] = 0.1 * jax.random.normal(keys[9], (F3,), jnp.float32)
    return p


def prepare_params(p):
    """One-time (outside jit) lowering of the PyTorch-layout parameters into
    lane-dense matmul weights.  Both convolutions are linear maps on a fixed,
    tiny spatial grid, so they are materialized as dense matrices whose
    column order equals the PyTorch NCHW flatten; fc1 then needs no
    activation permutation at all."""
    w1 = np.asarray(p["conv1_w"], np.float32)   # (6, 1, 5, 5)
    b1 = np.asarray(p["conv1_b"], np.float32)
    w2 = np.asarray(p["conv2_w"], np.float32)   # (12, 6, 5, 5)
    b2 = np.asarray(p["conv2_b"], np.float32)

    # conv1: (144, 384).  Row = ih*12 + iw ; column = c1*64 + oh*8 + ow.
    W1F = np.zeros((D0, D1), np.float32)
    b1F = np.zeros((1, D1), np.float32)
    for c1 in range(C1):
        for oh in range(H1):
            for ow in range(H1):
                o = c1 * H1 * H1 + oh * H1 + ow
                b1F[0, o] = b1[c1]
                for di in range(KS):
                    for dj in range(KS):
                        W1F[(oh + di) * H0 + (ow + dj), o] = w1[c1, 0, di, dj]

    # conv2: (384, 192).  Row = c1*64 + ih*8 + iw ; column = c2*16 + oh*4 + ow
    # (== PyTorch x.view(-1, 12*4*4) feature order).
    W2F = np.zeros((D1, D2), np.float32)
    b2F = np.zeros((1, D2), np.float32)
    for c2 in range(C2):
        for oh in range(H2):
            for ow in range(H2):
                o = c2 * H2 * H2 + oh * H2 + ow
                b2F[0, o] = b2[c2]
                for c1 in range(C1):
                    for di in range(KS):
                        for dj in range(KS):
                            W2F[c1 * H1 * H1 + (oh + di) * H1 + (ow + dj), o] = \
                                w2[c2, c1, di, dj]

    wf1 = np.asarray(p["fc1_w"], np.float32).T               # (192, 120)
    bf1 = np.asarray(p["fc1_b"], np.float32).reshape(1, F1)
    wf2 = np.asarray(p["fc2_w"], np.float32).T               # (120, 60)
    bf2 = np.asarray(p["fc2_b"], np.float32).reshape(1, F2)

    # out layer zero-padded to 128 columns -> lane-dense output store.
    wo = np.zeros((F2, OUT_PAD), np.float32)
    wo[:, :F3] = np.asarray(p["out_w"], np.float32).T        # (60, 128)
    bo = np.zeros((1, OUT_PAD), np.float32)
    bo[0, :F3] = np.asarray(p["out_b"], np.float32)

    arrs = dict(w1=W1F, b1=b1F, w2=W2F, b2=b2F, wf1=wf1, bf1=bf1,
                wf2=wf2, bf2=bf2, wo=wo, bo=bo)
    return {k: jnp.asarray(v) for k, v in arrs.items()}


@jax.jit
def conv_neural_network_forward(t_nchw, prepped):
    n = t_nchw.shape[0]
    # NCHW with C == 1 -> flat (N, 144) is a pure reshape (no data movement).
    x = t_nchw.reshape(n, D0)
    logits_padded = cnn_forward_pallas(x, prepped)    # (N, 128)
    return logits_padded[:, :F3]                      # (N, 10)


# ----------------------------------------------------------------------------
# Pure-numpy reference (PyTorch semantics of the intended chained forward)
# ----------------------------------------------------------------------------
def _np_conv2d(x_nchw, wgt, bias):
    n, cin, h, wd = x_nchw.shape
    cout, _, k, _ = wgt.shape
    ho, wo = h - k + 1, wd - k + 1
    out = np.zeros((n, cout, ho, wo), np.float64)
    for di in range(k):
        for dj in range(k):
            patch = x_nchw[:, :, di:di + ho, dj:dj + wo]          # (n,cin,ho,wo)
            out += np.einsum("ncij,oc->noij", patch, wgt[:, :, di, dj])
    return out + bias[None, :, None, None]


def _reference_forward(t_nchw, p):
    f64 = lambda a: np.asarray(a, np.float64)
    x = np.maximum(_np_conv2d(f64(t_nchw), f64(p["conv1_w"]), f64(p["conv1_b"])), 0.0)
    x = np.maximum(_np_conv2d(x, f64(p["conv2_w"]), f64(p["conv2_b"])), 0.0)
    x = x.reshape(x.shape[0], -1)                                  # NCHW flatten
    x = np.maximum(x @ f64(p["fc1_w"]).T + f64(p["fc1_b"]), 0.0)
    x = np.maximum(x @ f64(p["fc2_w"]).T + f64(p["fc2_b"]), 0.0)
    return x @ f64(p["out_w"]).T + f64(p["out_b"])


if __name__ == "__main__":
    key = jax.random.PRNGKey(0)
    # Input consistent with fc1 = 12*4*4 and no pooling: (N, C=1, H=12, W=12)
    t = jax.random.normal(key, (2, 1, H0, H0), dtype=jnp.float32)

    params = init_params(seed=0)
    prepped = prepare_params(params)          # one-time host-side re-layout

    logits = conv_neural_network_forward(t, prepped)
    jax.block_until_ready(logits)

    assert logits.shape == (2, F3) and logits.dtype == jnp.float32
    ref = _reference_forward(np.asarray(t), params)
    np.testing.assert_allclose(np.asarray(logits), ref, rtol=2e-2, atol=2e-2)
    print("KERNEL_OK")
</pallas_src>

<mosaic_0001>
module attributes {stable_mosaic.version = 11 : i64} {
  func.func @_fused_cnn_kernel(%arg0: i32, %arg1: memref<2x144xf32, #tpu.memory_space<vmem>>, %arg2: memref<144x384xf32, #tpu.memory_space<vmem>>, %arg3: memref<1x384xf32, #tpu.memory_space<vmem>>, %arg4: memref<384x192xf32, #tpu.memory_space<vmem>>, %arg5: memref<1x192xf32, #tpu.memory_space<vmem>>, %arg6: memref<192x120xf32, #tpu.memory_space<vmem>>, %arg7: memref<1x120xf32, #tpu.memory_space<vmem>>, %arg8: memref<120x60xf32, #tpu.memory_space<vmem>>, %arg9: memref<1x60xf32, #tpu.memory_space<vmem>>, %arg10: memref<60x128xf32, #tpu.memory_space<vmem>>, %arg11: memref<1x128xf32, #tpu.memory_space<vmem>>, %arg12: memref<2x128xf32, #tpu.memory_space<vmem>>) attributes {dimension_semantics = [#tpu.dimension_semantics<parallel>], iteration_bounds = array<i64: 1>, scalar_prefetch = 0 : i64, scratch_operands = 0 : i64, tpu.core_type = #tpu.core_type<tc>, window_params = [{transform_indices = @transform_0, window_bounds = array<i64: 2, 144>}, {pipeline_mode = #tpu.pipeline_mode<synchronous>, transform_indices = @transform_1, window_bounds = array<i64: 144, 384>}, {pipeline_mode = #tpu.pipeline_mode<synchronous>, transform_indices = @transform_2, window_bounds = array<i64: 1, 384>}, {pipeline_mode = #tpu.pipeline_mode<synchronous>, transform_indices = @transform_3, window_bounds = array<i64: 384, 192>}, {pipeline_mode = #tpu.pipeline_mode<synchronous>, transform_indices = @transform_4, window_bounds = array<i64: 1, 192>}, {pipeline_mode = #tpu.pipeline_mode<synchronous>, transform_indices = @transform_5, window_bounds = array<i64: 192, 120>}, {pipeline_mode = #tpu.pipeline_mode<synchronous>, transform_indices = @transform_6, window_bounds = array<i64: 1, 120>}, {pipeline_mode = #tpu.pipeline_mode<synchronous>, transform_indices = @transform_7, window_bounds = array<i64: 120, 60>}, {pipeline_mode = #tpu.pipeline_mode<synchronous>, transform_indices = @transform_8, window_bounds = array<i64: 1, 60>}, {pipeline_mode = #tpu.pipeline_mode<synchronous>, transform_indices = @transform_9, window_bounds = array<i64: 60, 128>}, {pipeline_mode = #tpu.pipeline_mode<synchronous>, transform_indices = @transform_10, window_bounds = array<i64: 1, 128>}, {transform_indices = @transform_11, window_bounds = array<i64: 2, 128>}]} {
    %c0 = arith.constant 0 : index
    %c0_0 = arith.constant 0 : index
    %0 = vector.load %arg1[%c0, %c0_0] : memref<2x144xf32, #tpu.memory_space<vmem>>, vector<2x144xf32>
    %c0_1 = arith.constant 0 : index
    %c0_2 = arith.constant 0 : index
    %1 = vector.load %arg2[%c0_1, %c0_2] : memref<144x384xf32, #tpu.memory_space<vmem>>, vector<144x384xf32>
    %cst = arith.constant dense<0.000000e+00> : vector<2x384xf32>
    %2 = tpu.matmul %0, %1, %cst {dimension_numbers = #tpu.dot_dimension_numbers<[1], [0], [0], [1], [0, 0, 1, 1], [], []>} : vector<2x144xf32>, vector<144x384xf32>, vector<2x384xf32> -> vector<2x384xf32>
    %c0_3 = arith.constant 0 : index
    %c0_4 = arith.constant 0 : index
    %3 = vector.load %arg3[%c0_3, %c0_4] : memref<1x384xf32, #tpu.memory_space<vmem>>, vector<1x384xf32>
    %4 = vector.broadcast %3 : vector<1x384xf32> to vector<2x384xf32>
    %5 = arith.addf %2, %4 : vector<2x384xf32>
    %cst_5 = arith.constant 0.000000e+00 : f32
    %6 = vector.broadcast %cst_5 : f32 to vector<2x384xf32>
    %7 = arith.maximumf %5, %6 : vector<2x384xf32>
    %c0_6 = arith.constant 0 : index
    %c0_7 = arith.constant 0 : index
    %8 = vector.load %arg4[%c0_6, %c0_7] : memref<384x192xf32, #tpu.memory_space<vmem>>, vector<384x192xf32>
    %cst_8 = arith.constant dense<0.000000e+00> : vector<2x192xf32>
    %9 = tpu.matmul %7, %8, %cst_8 {dimension_numbers = #tpu.dot_dimension_numbers<[1], [0], [0], [1], [0, 0, 1, 1], [], []>} : vector<2x384xf32>, vector<384x192xf32>, vector<2x192xf32> -> vector<2x192xf32>
    %c0_9 = arith.constant 0 : index
    %c0_10 = arith.constant 0 : index
    %10 = vector.load %arg5[%c0_9, %c0_10] : memref<1x192xf32, #tpu.memory_space<vmem>>, vector<1x192xf32>
    %11 = vector.broadcast %10 : vector<1x192xf32> to vector<2x192xf32>
    %12 = arith.addf %9, %11 : vector<2x192xf32>
    %cst_11 = arith.constant 0.000000e+00 : f32
    %13 = vector.broadcast %cst_11 : f32 to vector<2x192xf32>
    %14 = arith.maximumf %12, %13 : vector<2x192xf32>
    %c0_12 = arith.constant 0 : index
    %c0_13 = arith.constant 0 : index
    %15 = vector.load %arg6[%c0_12, %c0_13] : memref<192x120xf32, #tpu.memory_space<vmem>>, vector<192x120xf32>
    %cst_14 = arith.constant dense<0.000000e+00> : vector<2x120xf32>
    %16 = tpu.matmul %14, %15, %cst_14 {dimension_numbers = #tpu.dot_dimension_numbers<[1], [0], [0], [1], [0, 0, 1, 1], [], []>} : vector<2x192xf32>, vector<192x120xf32>, vector<2x120xf32> -> vector<2x120xf32>
    %c0_15 = arith.constant 0 : index
    %c0_16 = arith.constant 0 : index
    %17 = vector.load %arg7[%c0_15, %c0_16] : memref<1x120xf32, #tpu.memory_space<vmem>>, vector<1x120xf32>
    %18 = vector.broadcast %17 : vector<1x120xf32> to vector<2x120xf32>
    %19 = arith.addf %16, %18 : vector<2x120xf32>
    %cst_17 = arith.constant 0.000000e+00 : f32
    %20 = vector.broadcast %cst_17 : f32 to vector<2x120xf32>
    %21 = arith.maximumf %19, %20 : vector<2x120xf32>
    %c0_18 = arith.constant 0 : index
    %c0_19 = arith.constant 0 : index
    %22 = vector.load %arg8[%c0_18, %c0_19] : memref<120x60xf32, #tpu.memory_space<vmem>>, vector<120x60xf32>
    %cst_20 = arith.constant dense<0.000000e+00> : vector<2x60xf32>
    %23 = tpu.matmul %21, %22, %cst_20 {dimension_numbers = #tpu.dot_dimension_numbers<[1], [0], [0], [1], [0, 0, 1, 1], [], []>} : vector<2x120xf32>, vector<120x60xf32>, vector<2x60xf32> -> vector<2x60xf32>
    %c0_21 = arith.constant 0 : index
    %c0_22 = arith.constant 0 : index
    %24 = vector.load %arg9[%c0_21, %c0_22] : memref<1x60xf32, #tpu.memory_space<vmem>>, vector<1x60xf32>
    %25 = vector.broadcast %24 : vector<1x60xf32> to vector<2x60xf32>
    %26 = arith.addf %23, %25 : vector<2x60xf32>
    %cst_23 = arith.constant 0.000000e+00 : f32
    %27 = vector.broadcast %cst_23 : f32 to vector<2x60xf32>
    %28 = arith.maximumf %26, %27 : vector<2x60xf32>
    %c0_24 = arith.constant 0 : index
    %c0_25 = arith.constant 0 : index
    %29 = vector.load %arg10[%c0_24, %c0_25] : memref<60x128xf32, #tpu.memory_space<vmem>>, vector<60x128xf32>
    %cst_26 = arith.constant dense<0.000000e+00> : vector<2x128xf32>
    %30 = tpu.matmul %28, %29, %cst_26 {dimension_numbers = #tpu.dot_dimension_numbers<[1], [0], [0], [1], [0, 0, 1, 1], [], []>} : vector<2x60xf32>, vector<60x128xf32>, vector<2x128xf32> -> vector<2x128xf32>
    %c0_27 = arith.constant 0 : index
    %c0_28 = arith.constant 0 : index
    %31 = vector.load %arg11[%c0_27, %c0_28] : memref<1x128xf32, #tpu.memory_space<vmem>>, vector<1x128xf32>
    %32 = vector.broadcast %31 : vector<1x128xf32> to vector<2x128xf32>
    %33 = arith.addf %30, %32 : vector<2x128xf32>
    %c0_29 = arith.constant 0 : index
    %c0_30 = arith.constant 0 : index
    %34 = vector.load %arg12[%c0_29, %c0_30] : memref<2x128xf32, #tpu.memory_space<vmem>>, vector<2x128xf32>
    tpu.vector_store %arg12[%c0_29, %c0_30], %33 {strides = array<i32>} : memref<2x128xf32, #tpu.memory_space<vmem>>, vector<2x128xf32>,
    return
  }
  func.func @transform_0(%arg0: i32) -> (i32, i32) {
    %c0_i32 = arith.constant 0 : i32
    %c0_i32_0 = arith.constant 0 : i32
    return %arg0, %c0_i32 : i32, i32
  }
  func.func @transform_1(%arg0: i32) -> (i32, i32) {
    %c0_i32 = arith.constant 0 : i32
    %c0_i32_0 = arith.constant 0 : i32
    %c0_i32_1 = arith.constant 0 : i32
    return %c0_i32, %c0_i32_0 : i32, i32
  }
  func.func @transform_2(%arg0: i32) -> (i32, i32) {
    %c0_i32 = arith.constant 0 : i32
    %c0_i32_0 = arith.constant 0 : i32
    %c0_i32_1 = arith.constant 0 : i32
    return %c0_i32, %c0_i32_0 : i32, i32
  }
  func.func @transform_3(%arg0: i32) -> (i32, i32) {
    %c0_i32 = arith.constant 0 : i32
    %c0_i32_0 = arith.constant 0 : i32
    %c0_i32_1 = arith.constant 0 : i32
    return %c0_i32, %c0_i32_0 : i32, i32
  }
  func.func @transform_4(%arg0: i32) -> (i32, i32) {
    %c0_i32 = arith.constant 0 : i32
    %c0_i32_0 = arith.constant 0 : i32
    %c0_i32_1 = arith.constant 0 : i32
    return %c0_i32, %c0_i32_0 : i32, i32
  }
  func.func @transform_5(%arg0: i32) -> (i32, i32) {
    %c0_i32 = arith.constant 0 : i32
    %c0_i32_0 = arith.constant 0 : i32
    %c0_i32_1 = arith.constant 0 : i32
    return %c0_i32, %c0_i32_0 : i32, i32
  }
  func.func @transform_6(%arg0: i32) -> (i32, i32) {
    %c0_i32 = arith.constant 0 : i32
    %c0_i32_0 = arith.constant 0 : i32
    %c0_i32_1 = arith.constant 0 : i32
    return %c0_i32, %c0_i32_0 : i32, i32
  }
  func.func @transform_7(%arg0: i32) -> (i32, i32) {
    %c0_i32 = arith.constant 0 : i32
    %c0_i32_0 = arith.constant 0 : i32
    %c0_i32_1 = arith.constant 0 : i32
    return %c0_i32, %c0_i32_0 : i32, i32
  }
  func.func @transform_8(%arg0: i32) -> (i32, i32) {
    %c0_i32 = arith.constant 0 : i32
    %c0_i32_0 = arith.constant 0 : i32
    %c0_i32_1 = arith.constant 0 : i32
    return %c0_i32, %c0_i32_0 : i32, i32
  }
  func.func @transform_9(%arg0: i32) -> (i32, i32) {
    %c0_i32 = arith.constant 0 : i32
    %c0_i32_0 = arith.constant 0 : i32
    %c0_i32_1 = arith.constant 0 : i32
    return %c0_i32, %c0_i32_0 : i32, i32
  }
  func.func @transform_10(%arg0: i32) -> (i32, i32) {
    %c0_i32 = arith.constant 0 : i32
    %c0_i32_0 = arith.constant 0 : i32
    %c0_i32_1 = arith.constant 0 : i32
    return %c0_i32, %c0_i32_0 : i32, i32
  }
  func.func @transform_11(%arg0: i32) -> (i32, i32) {
    %c0_i32 = arith.constant 0 : i32
    %c0_i32_0 = arith.constant 0 : i32
    return %arg0, %c0_i32 : i32, i32
  }
}

</mosaic_0001>

<bundles_post_ra>
// kernel: conv_neural_network_forward.1
= control target key start
LH: loop header
LB: loop body
LE: loop exit
PB: predicated region body
PF: predicated region fallthrough
CT: control target
= control target key end

     0   :  { %v1180_v7 = vmov 0.0|0.0   ;;  %vm121_vm0 = vcmask 130048   ;;  %s1930_s0 = inlined_call_operand.vmem [shape: f32[2,144], index: 0, kind: input, shape index: {}]   ;;  %s1931_s1 = inlined_call_operand.vmem [shape: f32[144,384], index: 1, kind: input, shape index: {}]   ;;  %s1932_s2 = inlined_call_operand.vmem [shape: f32[1,384], index: 2, kind: input, shape index: {}]   ;;  %s1933_s3 = inlined_call_operand.vmem [shape: f32[384,192], index: 3, kind: input, shape index: {}]   ;;  %s1934_s4 = inlined_call_operand.vmem [shape: f32[1,192], index: 4, kind: input, shape index: {}]   ;;  %s1935_s5 = inlined_call_operand.vmem [shape: f32[192,120], index: 5, kind: input, shape index: {}]   ;;  %s1936_s6 = inlined_call_operand.vmem [shape: f32[1,120], index: 6, kind: input, shape index: {}]   ;;  %s1937_s7 = inlined_call_operand.vmem [shape: f32[120,60], index: 7, kind: input, shape index: {}]   ;;  %s1938_s8 = inlined_call_operand.vmem [shape: f32[1,60], index: 8, kind: input, shape index: {}]   ;;  %s1939_s9 = inlined_call_operand.vmem [shape: f32[60,128], index: 9, kind: input, shape index: {}]   ;;  %s1940_s10 = inlined_call_operand.vmem [shape: f32[1,128], index: 10, kind: input, shape index: {}]   ;;  %s1941_s11 = inlined_call_operand.hbm [shape: f32[2,128], index: 11, kind: output, shape index: {}]  }
   0x1   :  { %v41_v0 = vld [vmem:[%s1931_s1 + $0x8] sm:$0xff]  ;;  %v44_v1 = vld [vmem:[%s1931_s1 + $0x20] sm:$0xff]  ;;  %v43_v4 = vld [vmem:[%s1931_s1 + $0x18] sm:$0xff]  ;;  %954 = vmatprep.subr.bf16.mxu1 %v1180_v7 }
   0x2   :  { %v40_v2 = vld [vmem:[%s1931_s1] sm:$0xff]  ;;  %v918_v3 = vpack.c.bf16 %v44_v1, %v41_v0  ;;  %v47_v5 = vld [vmem:[%s1931_s1 + $0x38] sm:$0xff]  ;;  %v50_v6 = vld [vmem:[%s1931_s1 + $0x50] sm:$0xff] }
   0x3   :  { %v920_v8 = vpack.c.bf16 %v43_v4, %v40_v2  ;;  %v922_v9 = vpack.c.bf16 %v50_v6, %v47_v5  ;;  %v46_v10 = vld [vmem:[%s1931_s1 + $0x30] sm:$0xff]  ;;  %v49_v11 = vld [vmem:[%s1931_s1 + $0x48] sm:$0xff]  ;;  %v56_v13 = vld [vmem:[%s1931_s1 + $0x80] sm:$0xff] }
   0x4   :  { %v53_v12 = vld [vmem:[%s1931_s1 + $0x68] sm:$0xff]  ;;  %919 = vmatprep.subr.bf16.mxu0 %v918_v3  ;;  %v924_v14 = vpack.c.bf16 %v49_v11, %v46_v10  ;;  %v52_v16 = vld [vmem:[%s1931_s1 + $0x60] sm:$0xff]  ;;  %v55_v17 = vld [vmem:[%s1931_s1 + $0x78] sm:$0xff] }
   0x5   :  { %921 = vmatpush1.bf16.msra.mxu0 %v920_v8  ;;  %v926_v15 = vpack.c.bf16 %v56_v13, %v53_v12  ;;  %v59_v18 = vld [vmem:[%s1931_s1 + $0x98] sm:$0xff]  ;;  %v62_v19 = vld [vmem:[%s1931_s1 + $0xb0] sm:$0xff]  ;;  %v928_v20 = vpack.c.bf16 %v55_v17, %v52_v16  ;;  %v61_v23 = vld [vmem:[%s1931_s1 + $0xa8] sm:$0xff] }
   0x6   :  { %923 = vmatprep.subr.bf16.mxu0 %v922_v9  ;;  %v930_v21 = vpack.c.bf16 %v62_v19, %v59_v18  ;;  %v58_v22 = vld [vmem:[%s1931_s1 + $0x90] sm:$0xff]  ;;  %v65_v24 = vld [vmem:[%s1931_s1 + $0xc8] sm:$0xff]  ;;  %v68_v25 = vld [vmem:[%s1931_s1 + $0xe0] sm:$0xff] }
   0x7   :  { %v64_v26 = vld [vmem:[%s1931_s1 + $0xc0] sm:$0xff]  ;;  %v932_v27 = vpack.c.bf16 %v61_v23, %v58_v22  ;;  %v42_v28 = vld [vmem:[%s1931_s1 + $0x10] sm:$0xff]  ;;  %v45_v29 = vld [vmem:[%s1931_s1 + $0x28] sm:$0xff]  ;;  %v934_v31 = vpack.c.bf16 %v68_v25, %v65_v24 }
   0x8   :  { %v1312_v30 = vld.sshfl [vmem:[%s1930_s0] sm:$0x33 pattern:$0x76325410]  ;;  %v67_v32 = vld [vmem:[%s1931_s1 + $0xd8] sm:$0xff]  ;;  %v955_v33 = vpack.c.bf16 %v45_v29, %v42_v28  ;;  %v74_v38 = vld [vmem:[%s1931_s1 + $0x110] sm:$0xff] }
   0x9   :  { %925 = vmatpush1.bf16.msra.mxu0 %v924_v14  ;;  %v119_v34 = vcombine.high %v1312_v30, %v1312_v30  ;;  %v48_v35 = vld [vmem:[%s1931_s1 + $0x40] sm:$0xff]  ;;  %v51_v36 = vld [vmem:[%s1931_s1 + $0x58] sm:$0xff]  ;;  %v936_v40 = vpack.c.bf16 %v67_v32, %v64_v26  ;;  %v54_v41 = vld [vmem:[%s1931_s1 + $0x70] sm:$0xff] }
   0xa   :  { %927 = vmatprep.subr.bf16.mxu0 %v926_v15  ;;  %v71_v37 = vld [vmem:[%s1931_s1 + $0xf8] sm:$0xff]  ;;  %956 = vmatpush1.bf16.msra.mxu1 %v955_v33  ;;  %v958_v39 = vpack.c.bf16 %v51_v36, %v48_v35  ;;  %v57_v42 = vld [vmem:[%s1931_s1 + $0x88] sm:$0xff]  ;;  %v70_v44 = vld [vmem:[%s1931_s1 + $0xf0] sm:$0xff] }
   0xb   :  { %832 = vmatprep.mubr.msk.f32.mxu0 %vm121_vm0, %v119_v34  ;;  %957 = vmatprep.subr.bf16.mxu1 %v1180_v7  ;;  %v938_v43 = vpack.c.bf16 %v74_v38, %v71_v37  ;;  %v73_v45 = vld [vmem:[%s1931_s1 + $0x108] sm:$0xff]  ;;  %v80_v47 = vld [vmem:[%s1931_s1 + $0x140] sm:$0xff]  ;;  %v961_v48 = vpack.c.bf16 %v57_v42, %v54_v41  ;;  %v63_v51 = vld [vmem:[%s1931_s1 + $0xb8] sm:$0xff] }
   0xc   :  { %833 = vmatprep.mubr.msk.f32.mxu1 %vm121_vm0, %v119_v34  ;;  %v77_v46 = vld [vmem:[%s1931_s1 + $0x128] sm:$0xff]  ;;  %v940_v49 = vpack.c.bf16 %v73_v45, %v70_v44  ;;  %v60_v50 = vld [vmem:[%s1931_s1 + $0xa0] sm:$0xff]  ;;  %v79_v54 = vld [vmem:[%s1931_s1 + $0x138] sm:$0xff] }
   0xd   :  { %929 = vmatpush1.bf16.msra.mxu0 %v928_v20  ;;  %v942_v52 = vpack.c.bf16 %v80_v47, %v77_v46  ;;  %v76_v53 = vld [vmem:[%s1931_s1 + $0x120] sm:$0xff]  ;;  %v83_v55 = vld [vmem:[%s1931_s1 + $0x158] sm:$0xff]  ;;  %v86_v56 = vld [vmem:[%s1931_s1 + $0x170] sm:$0xff]  ;;  %v964_v57 = vpack.c.bf16 %v63_v51, %v60_v50 }
   0xe   :  { %931 = vmatprep.subr.bf16.mxu0 %v930_v21  ;;  %959 = vmatpush1.bf16.msra.mxu1 %v958_v39  ;;  %v944_v58 = vpack.c.bf16 %v79_v54, %v76_v53  ;;  %v66_v59 = vld [vmem:[%s1931_s1 + $0xd0] sm:$0xff]  ;;  %v69_v60 = vld [vmem:[%s1931_s1 + $0xe8] sm:$0xff]  ;;  %v946_v61 = vpack.c.bf16 %v86_v56, %v83_v55  ;;  %v92_v1 = vld [vmem:[%s1931_s1 + $0x1a0] sm:$0xff] }
   0xf   :  { %960 = vmatprep.subr.bf16.mxu1 %v1180_v7  ;;  %v82_v62 = vld [vmem:[%s1931_s1 + $0x150] sm:$0xff]  ;;  %v85_v63 = vld [vmem:[%s1931_s1 + $0x168] sm:$0xff]  ;;  %v967_v2 = vpack.c.bf16 %v69_v60, %v66_v59  ;;  %v72_v4 = vld [vmem:[%s1931_s1 + $0x100] sm:$0xff] }
  0x10   :  { %v89_v0 = vld [vmem:[%s1931_s1 + $0x188] sm:$0xff]  ;;  %v948_v3 = vpack.c.bf16 %v85_v63, %v82_v62  ;;  %v75_v5 = vld [vmem:[%s1931_s1 + $0x118] sm:$0xff]  ;;  %v88_v8 = vld [vmem:[%s1931_s1 + $0x180] sm:$0xff] }
  0x11   :  { %933 = vmatpush1.bf16.msra.mxu0 %v932_v27  ;;  %v950_v6 = vpack.c.bf16 %v92_v1, %v89_v0  ;;  %v91_v9 = vld [vmem:[%s1931_s1 + $0x198] sm:$0xff]  ;;  %v269_v10 = vld [vmem:[%s1933_s3 + $0x8] sm:$0xff]  ;;  %v970_v12 = vpack.c.bf16 %v75_v5, %v72_v4  ;;  %v78_v14 = vld [vmem:[%s1931_s1 + $0x130] sm:$0xff] }
  0x12   :  { %935 = vmatprep.subr.bf16.mxu0 %v934_v31  ;;  %962 = vmatpush1.bf16.msra.mxu1 %v961_v48  ;;  %v271_v11 = vld [vmem:[%s1933_s3 + $0x18] sm:$0xff]  ;;  %v952_v13 = vpack.c.bf16 %v91_v9, %v88_v8  ;;  %v81_v15 = vld [vmem:[%s1931_s1 + $0x148] sm:$0xff]  ;;  %v268_v17 = vld [vmem:[%s1933_s3] sm:$0xff] }
  0x13   :  { %963 = vmatprep.subr.bf16.mxu1 %v1180_v7  ;;  %v981_v16 = vpack.c.bf16 %v271_v11, %v269_v10  ;;  %v270_v18 = vld [vmem:[%s1933_s3 + $0x10] sm:$0xff]  ;;  %v273_v19 = vld [vmem:[%s1933_s3 + $0x28] sm:$0xff]  ;;  %v275_v20 = vld [vmem:[%s1933_s3 + $0x38] sm:$0xff]  ;;  %v973_v21 = vpack.c.bf16 %v81_v15, %v78_v14 }
  0x14   :  { %v84_v22 = vld [vmem:[%s1931_s1 + $0x160] sm:$0xff]  ;;  %v87_v23 = vld [vmem:[%s1931_s1 + $0x178] sm:$0xff]  ;;  %v983_v24 = vpack.c.bf16 %v270_v18, %v268_v17  ;;  %v985_v25 = vpack.c.bf16 %v275_v20, %v273_v19  ;;  %v274_v27 = vld [vmem:[%s1933_s3 + $0x30] sm:$0xff] }
  0x15   :  { %937 = vmatpush1.bf16.msra.mxu0 %v936_v40  ;;  %v272_v26 = vld [vmem:[%s1933_s3 + $0x20] sm:$0xff]  ;;  %v277_v28 = vld [vmem:[%s1933_s3 + $0x48] sm:$0xff]  ;;  %v279_v29 = vld [vmem:[%s1933_s3 + $0x58] sm:$0xff] }
  0x16   :  { %939 = vmatprep.subr.bf16.mxu0 %v938_v43  ;;  %965 = vmatpush1.bf16.msra.mxu1 %v964_v57 }
  0x17   :  { %966 = vmatprep.subr.bf16.mxu1 %v1180_v7 }
  0x19   :  { %941 = vmatpush1.bf16.msra.mxu0 %v940_v49 }
  0x1a   :  { %943 = vmatprep.subr.bf16.mxu0 %v942_v52  ;;  %968 = vmatpush1.bf16.msra.mxu1 %v967_v2 }
  0x1b   :  { %969 = vmatprep.subr.bf16.mxu1 %v1180_v7 }
  0x1d   :  { %945 = vmatpush1.bf16.msra.mxu0 %v944_v58 }
  0x1e   :  { %947 = vmatprep.subr.bf16.mxu0 %v946_v61  ;;  %971 = vmatpush1.bf16.msra.mxu1 %v970_v12 }
  0x1f   :  { %972 = vmatprep.subr.bf16.mxu1 %v1180_v7 }
  0x21   :  { %949 = vmatpush1.bf16.msra.mxu0 %v948_v3 }
  0x22   :  { %951 = vmatprep.subr.bf16.mxu0 %v950_v6 }
  0x25   :  { %953 = vmatpush1.bf16.msra.mxu0 %v952_v13 }
  0x26   :  { %982 = vmatprep.subr.bf16.mxu0 %v981_v16 }
  0x27   :  { %16 = vsyncpa [#allocation3], 0  ;;  %974 = vmatpush1.bf16.msra.mxu1 %v973_v21  ;;  %v976_v31 = vpack.c.bf16 %v87_v23, %v84_v22  ;;  %v90_v32 = vld [vmem:[%s1931_s1 + $0x190] sm:$0xff]  ;;  %v93_v33 = vld [vmem:[%s1931_s1 + $0x1a8] sm:$0xff]  ;;  %v987_v34 = vpack.c.bf16 %v274_v27, %v272_v26  ;;  %v989_v35 = vpack.c.bf16 %v279_v29, %v277_v28  ;;  %vm551_vm1 = vcmask 523264  }
  0x28   :  { %189 = vmatmul.mubr.f32.vlgmr.msra.gmra.mrb[0].mxu0 %v1312_v30  ;;  %975 = vmatprep.subr.bf16.mxu1 %v1180_v7  ;;  %v276_v36 = vld [vmem:[%s1933_s3 + $0x40] sm:$0xff]  ;;  %v278_v37 = vld [vmem:[%s1933_s3 + $0x50] sm:$0xff]  ;;  %v281_v38 = vld [vmem:[%s1933_s3 + $0x68] sm:$0xff]  ;;  %v979_v40 = vpack.c.bf16 %v93_v33, %v90_v32  ;;  %vm1182_vm2 = vmmov 0   ;;  %vm648_vm3 = vcmask 982016   ;;  %vm742_vm4 = vcmask 1043456  }
  0x29   :  { %984 = vmatpush1.bf16.msra.mxu0 %v983_v24  ;;  %v283_v39 = vld [vmem:[%s1933_s3 + $0x78] sm:$0xff]  ;;  %v991_v41 = vpack.c.bf16 %v278_v37, %v276_v36  ;;  %v280_v43 = vld [vmem:[%s1933_s3 + $0x60] sm:$0xff]  ;;  %v282_v44 = vld [vmem:[%s1933_s3 + $0x70] sm:$0xff]  ;;  %vm1183_vm5 = vmmov 1   ;;  %vm738_vm7 = vcmask 490496  }
  0x2a   :  { %986 = vmatprep.subr.bf16.mxu0 %v985_v25  ;;  %v993_v42 = vpack.c.bf16 %v283_v39, %v281_v38  ;;  %v285_v45 = vld [vmem:[%s1933_s3 + $0x88] sm:$0xff]  ;;  %v287_v46 = vld [vmem:[%s1933_s3 + $0x98] sm:$0xff]  ;;  %v995_v47 = vpack.c.bf16 %v282_v44, %v280_v43  ;;  %v284_v49 = vld [vmem:[%s1933_s3 + $0x80] sm:$0xff] }
  0x2b   :  { %977 = vmatpush1.bf16.msra.mxu1 %v976_v31  ;;  %v997_v48 = vpack.c.bf16 %v287_v46, %v285_v45  ;;  %v286_v50 = vld [vmem:[%s1933_s3 + $0x90] sm:$0xff]  ;;  %v289_v51 = vld [vmem:[%s1933_s3 + $0xa8] sm:$0xff]  ;;  %v291_v52 = vld [vmem:[%s1933_s3 + $0xb8] sm:$0xff] }
  0x2c   :  { %978 = vmatprep.subr.bf16.mxu1 %v1180_v7  ;;  %v999_v53 = vpack.c.bf16 %v286_v50, %v284_v49  ;;  %v1001_v54 = vpack.c.bf16 %v291_v52, %v289_v51  ;;  %v288_v55 = vld [vmem:[%s1933_s3 + $0xa0] sm:$0xff]  ;;  %v293_v56 = vld [vmem:[%s1933_s3 + $0xc8] sm:$0xff]  ;;  %v295_v57 = vld [vmem:[%s1933_s3 + $0xd8] sm:$0xff] }
  0x2d   :  { %988 = vmatpush1.bf16.msra.mxu0 %v987_v34  ;;  %v1005_v59 = vpack.c.bf16 %v295_v57, %v293_v56  ;;  %v292_v60 = vld [vmem:[%s1933_s3 + $0xc0] sm:$0xff]  ;;  %v294_v61 = vld [vmem:[%s1933_s3 + $0xd0] sm:$0xff]  ;;  %v297_v62 = vld [vmem:[%s1933_s3 + $0xe8] sm:$0xff] }
  0x2e   :  { %990 = vmatprep.subr.bf16.mxu0 %v989_v35  ;;  %v299_v63 = vld [vmem:[%s1933_s3 + $0xf8] sm:$0xff]  ;;  %v1007_v0 = vpack.c.bf16 %v294_v61, %v292_v60  ;;  %v296_v2 = vld [vmem:[%s1933_s3 + $0xe0] sm:$0xff]  ;;  %v298_v3 = vld [vmem:[%s1933_s3 + $0xf0] sm:$0xff] }
  0x2f   :  { %980 = vmatpush1.bf16.msra.mxu1 %v979_v40  ;;  %v1009_v1 = vpack.c.bf16 %v299_v63, %v297_v62  ;;  %v301_v4 = vld [vmem:[%s1933_s3 + $0x108] sm:$0xff]  ;;  %v303_v5 = vld [vmem:[%s1933_s3 + $0x118] sm:$0xff]  ;;  %v1011_v6 = vpack.c.bf16 %v298_v3, %v296_v2  ;;  %v300_v9 = vld [vmem:[%s1933_s3 + $0x100] sm:$0xff] }
  0x30   :  { %1077 = vmatprep.subr.bf16.mxu1 %v1180_v7  ;;  %v1013_v8 = vpack.c.bf16 %v303_v5, %v301_v4  ;;  %v302_v10 = vld [vmem:[%s1933_s3 + $0x110] sm:$0xff]  ;;  %v305_v11 = vld [vmem:[%s1933_s3 + $0x128] sm:$0xff]  ;;  %v307_v12 = vld [vmem:[%s1933_s3 + $0x138] sm:$0xff] }
  0x31   :  { %992 = vmatpush1.bf16.msra.mxu0 %v991_v41  ;;  %v1015_v13 = vpack.c.bf16 %v302_v10, %v300_v9  ;;  %v1017_v14 = vpack.c.bf16 %v307_v12, %v305_v11  ;;  %v304_v15 = vld [vmem:[%s1933_s3 + $0x120] sm:$0xff]  ;;  %v306_v16 = vld [vmem:[%s1933_s3 + $0x130] sm:$0xff]  ;;  %v309_v17 = vld [vmem:[%s1933_s3 + $0x148] sm:$0xff] }
  0x32   :  { %994 = vmatprep.subr.bf16.mxu0 %v993_v42  ;;  %260 = vmatmul.mubr.f32.vlgmr.msra.gmra.mrb[0].mxu1 %v1312_v30  ;;  %v290_v30 = vld [vmem:[%s1933_s3 + $0xb0] sm:$0xff]  ;;  %v311_v18 = vld [vmem:[%s1933_s3 + $0x158] sm:$0xff]  ;;  %v1019_v19 = vpack.c.bf16 %v306_v16, %v304_v15  ;;  %v308_v21 = vld [vmem:[%s1933_s3 + $0x140] sm:$0xff] }
  0x33   :  { %v1003_v58 = vpack.c.bf16 %v290_v30, %v288_v55  ;;  %v1021_v20 = vpack.c.bf16 %v311_v18, %v309_v17  ;;  %v310_v22 = vld [vmem:[%s1933_s3 + $0x150] sm:$0xff]  ;;  %v313_v23 = vld [vmem:[%s1933_s3 + $0x168] sm:$0xff]  ;;  %v315_v24 = vld [vmem:[%s1933_s3 + $0x178] sm:$0xff] }
  0x34   :  { %v1023_v25 = vpack.c.bf16 %v310_v22, %v308_v21  ;;  %v1025_v26 = vpack.c.bf16 %v315_v24, %v313_v23  ;;  %v312_v27 = vld [vmem:[%s1933_s3 + $0x160] sm:$0xff]  ;;  %v314_v28 = vld [vmem:[%s1933_s3 + $0x170] sm:$0xff]  ;;  %v317_v29 = vld [vmem:[%s1933_s3 + $0x188] sm:$0xff]  ;;  %v96_v24 = vlaneseq }
  0x35   :  { %996 = vmatpush1.bf16.msra.mxu0 %v995_v47  ;;  %v319_v31 = vld [vmem:[%s1933_s3 + $0x198] sm:$0xff]  ;;  %v1027_v32 = vpack.c.bf16 %v314_v28, %v312_v27  ;;  %v316_v34 = vld [vmem:[%s1933_s3 + $0x180] sm:$0xff]  ;;  %v318_v35 = vld [vmem:[%s1933_s3 + $0x190] sm:$0xff] }
  0x36   :  { %998 = vmatprep.subr.bf16.mxu0 %v997_v48  ;;  %v1029_v33 = vpack.c.bf16 %v319_v31, %v317_v29  ;;  %v321_v36 = vld [vmem:[%s1933_s3 + $0x1a8] sm:$0xff]  ;;  %v323_v37 = vld [vmem:[%s1933_s3 + $0x1b8] sm:$0xff]  ;;  %v1031_v38 = vpack.c.bf16 %v318_v35, %v316_v34  ;;  %v320_v40 = vld [vmem:[%s1933_s3 + $0x1a0] sm:$0xff] }
  0x37   :  { %v1033_v39 = vpack.c.bf16 %v323_v37, %v321_v36  ;;  %v322_v41 = vld [vmem:[%s1933_s3 + $0x1b0] sm:$0xff]  ;;  %v325_v42 = vld [vmem:[%s1933_s3 + $0x1c8] sm:$0xff]  ;;  %v327_v43 = vld [vmem:[%s1933_s3 + $0x1d8] sm:$0xff] }
  0x38   :  { %v1035_v44 = vpack.c.bf16 %v322_v41, %v320_v40  ;;  %v1037_v45 = vpack.c.bf16 %v327_v43, %v325_v42  ;;  %v324_v46 = vld [vmem:[%s1933_s3 + $0x1c0] sm:$0xff]  ;;  %v326_v47 = vld [vmem:[%s1933_s3 + $0x1d0] sm:$0xff]  ;;  %v329_v49 = vld [vmem:[%s1933_s3 + $0x1e8] sm:$0xff] }
  0x39   :  { %1000 = vmatpush1.bf16.msra.mxu0 %v999_v53  ;;  %v1039_v48 = vpack.c.bf16 %v326_v47, %v324_v46  ;;  %v331_v50 = vld [vmem:[%s1933_s3 + $0x1f8] sm:$0xff]  ;;  %v328_v52 = vld [vmem:[%s1933_s3 + $0x1e0] sm:$0xff]  ;;  %v330_v53 = vld [vmem:[%s1933_s3 + $0x1f0] sm:$0xff] }
  0x3a   :  { %1002 = vmatprep.subr.bf16.mxu0 %v1001_v54  ;;  %v1041_v51 = vpack.c.bf16 %v331_v50, %v329_v49  ;;  %v1043_v54 = vpack.c.bf16 %v330_v53, %v328_v52  ;;  %v333_v55 = vld [vmem:[%s1933_s3 + $0x208] sm:$0xff]  ;;  %v335_v30 = vld [vmem:[%s1933_s3 + $0x218] sm:$0xff]  ;;  %v520_v57 = vld [vmem:[%s1935_s5] sm:$0xff]  ;;  %v1181_v49 = vmov 0.0  }
  0x3b   :  { %v1045_v56 = vpack.c.bf16 %v335_v30, %v333_v55  ;;  %v523_v61 = vld [vmem:[%s1935_s5 + $0x18] sm:$0xff]  ;;  %v524_v63 = vld [vmem:[%s1935_s5 + $0x20] sm:$0xff]  ;;  %v526_v2 = vld [vmem:[%s1935_s5 + $0x30] sm:$0xff] }
  0x3c   :  { %v527_v3 = vld [vmem:[%s1935_s5 + $0x38] sm:$0xff]  ;;  %v528_v5 = vld [vmem:[%s1935_s5 + $0x40] sm:$0xff]  ;;  %v530_v9 = vld [vmem:[%s1935_s5 + $0x50] sm:$0xff] }
  0x3d   :  { %1004 = vmatpush1.bf16.msra.mxu0 %v1003_v58  ;;  %v521_v58 = vld [vmem:[%s1935_s5 + $0x8] sm:$0xff]  ;;  %v1087_v4 = vpack.c.bf16 %v527_v3, %v526_v2  ;;  %v531_v10 = vld [vmem:[%s1935_s5 + $0x58] sm:$0xff]  ;;  %v532_v12 = vld [vmem:[%s1935_s5 + $0x60] sm:$0xff] }
  0x3e   :  { %1006 = vmatprep.subr.bf16.mxu0 %v1005_v59  ;;  %v522_v59 = vld [vmem:[%s1935_s5 + $0x10] sm:$0xff]  ;;  %v1078_v60 = vpack.c.bf16 %v521_v58, %v520_v57  ;;  %v1093_v11 = vpack.c.bf16 %v531_v10, %v530_v9  ;;  %v535_v16 = vld [vmem:[%s1935_s5 + $0x78] sm:$0xff]  ;;  %v536_v18 = vld [vmem:[%s1935_s5 + $0x80] sm:$0xff] }
  0x3f   :  { %v1081_v62 = vpack.c.bf16 %v523_v61, %v522_v59  ;;  %v534_v15 = vld [vmem:[%s1935_s5 + $0x70] sm:$0xff]  ;;  %v539_v22 = vld [vmem:[%s1935_s5 + $0x98] sm:$0xff]  ;;  %v1702_v27 = vld [vmem:[%s1932_s2] sm:$0x7] }
  0x40   :  { %1079 = vmatpush1.bf16.msra.mxu1 %v1078_v60  ;;  %v1099_v17 = vpack.c.bf16 %v535_v16, %v534_v15  ;;  %v538_v21 = vld [vmem:[%s1935_s5 + $0x90] sm:$0xff]  ;;  %v332_v35 = vld [vmem:[%s1933_s3 + $0x200] sm:$0xff]  ;;  %v341_v46 = vld [vmem:[%s1933_s3 + $0x248] sm:$0xff] }
  0x41   :  { %1008 = vmatpush1.bf16.msra.mxu0 %v1007_v0  ;;  %1080 = vmatprep.subr.bf16.mxu1 %v1180_v7  ;;  %v525_v0 = vld [vmem:[%s1935_s5 + $0x28] sm:$0xff]  ;;  %v1105_v23 = vpack.c.bf16 %v539_v22, %v538_v21  ;;  %v334_v36 = vld [vmem:[%s1933_s3 + $0x210] sm:$0xff]  ;;  %v343_v47 = vld [vmem:[%s1933_s3 + $0x258] sm:$0xff] }
  0x42   :  { %1010 = vmatprep.subr.bf16.mxu0 %v1009_v1  ;;  %v1084_v1 = vpack.c.bf16 %v525_v0, %v524_v63  ;;  %v1047_v41 = vpack.c.bf16 %v334_v36, %v332_v35  ;;  %v1053_v50 = vpack.c.bf16 %v343_v47, %v341_v46  ;;  %v342_v52 = vld [vmem:[%s1933_s3 + $0x250] sm:$0xff]  ;;  %v345_v53 = vld [vmem:[%s1933_s3 + $0x268] sm:$0xff]  ;;  %v344_v58 = vld [vmem:[%s1933_s3 + $0x260] sm:$0xff] }
  0x43   :  { %v346_v59 = vld [vmem:[%s1933_s3 + $0x270] sm:$0xff]  ;;  %v349_v60 = vld [vmem:[%s1933_s3 + $0x288] sm:$0xff]  ;;  %v351_v61 = vld [vmem:[%s1933_s3 + $0x298] sm:$0xff] }
  0x44   :  { %1082 = vmatpush1.bf16.msra.mxu1 %v1081_v62  ;;  %v1059_v62 = vpack.c.bf16 %v346_v59, %v344_v58  ;;  %v1061_v63 = vpack.c.bf16 %v351_v61, %v349_v60  ;;  %v348_v0 = vld [vmem:[%s1933_s3 + $0x280] sm:$0xff]  ;;  %v353_v2 = vld [vmem:[%s1933_s3 + $0x2a8] sm:$0xff]  ;;  %v355_v3 = vld [vmem:[%s1933_s3 + $0x2b8] sm:$0xff] }
  0x45   :  { %1012 = vmatpush1.bf16.msra.mxu0 %v1011_v6  ;;  %1083 = vmatprep.subr.bf16.mxu1 %v1180_v7  ;;  %v529_v6 = vld [vmem:[%s1935_s5 + $0x48] sm:$0xff]  ;;  %v359_v10 = vld [vmem:[%s1933_s3 + $0x2d8] sm:$0xff]  ;;  %v358_v15 = vld [vmem:[%s1933_s3 + $0x2d0] sm:$0xff] }
  0x46   :  { %1014 = vmatprep.subr.bf16.mxu0 %v1013_v8  ;;  %v1090_v8 = vpack.c.bf16 %v529_v6, %v528_v5  ;;  %v1065_v5 = vpack.c.bf16 %v355_v3, %v353_v2  ;;  %v352_v6 = vld [vmem:[%s1933_s3 + $0x2a0] sm:$0xff]  ;;  %v357_v9 = vld [vmem:[%s1933_s3 + $0x2c8] sm:$0xff]  ;;  %v362_v22 = vld [vmem:[%s1933_s3 + $0x2f0] sm:$0xff] }
  0x47   :  { %v361_v16 = vld [vmem:[%s1933_s3 + $0x2e8] sm:$0xff]  ;;  %v360_v21 = vld [vmem:[%s1933_s3 + $0x2e0] sm:$0xff]  ;;  %v637_v58 = vld [vmem:[%s1937_s7 + $0x58] sm:$0xff] }
  0x48   :  { %1085 = vmatpush1.bf16.msra.mxu1 %v1084_v1  ;;  %v350_v1 = vld [vmem:[%s1933_s3 + $0x290] sm:$0xff]  ;;  %v364_v36 = vld [vmem:[%s1934_s4] sm:$0x3]  ;;  %v639_v61 = vld [vmem:[%s1937_s7 + $0x68] sm:$0xff] }
  0x49   :  { %1016 = vmatpush1.bf16.msra.mxu0 %v1015_v13  ;;  %1086 = vmatprep.subr.bf16.mxu1 %v1180_v7  ;;  %v533_v13 = vld [vmem:[%s1935_s5 + $0x68] sm:$0xff]  ;;  %v638_v60 = vld [vmem:[%s1937_s7 + $0x60] sm:$0xff]  ;;  %vm1145_vm6 = vmpackc.low %vm742_vm4, %vm1183_vm5 }
  0x4a   :  { %1018 = vmatprep.subr.bf16.mxu0 %v1017_v14  ;;  %v1096_v14 = vpack.c.bf16 %v533_v13, %v532_v12  ;;  %v1069_v13 = vpack.c.bf16 %v359_v10, %v357_v9  ;;  %v724_v2 = vld [vmem:[%s1939_s9 + $0x8] sm:$0xff]  ;;  %v725_v9 = vld [vmem:[%s1939_s9 + $0x10] sm:$0xff]  ;;  %v726_v10 = vld [vmem:[%s1939_s9 + $0x18] sm:$0xff] }
  0x4c   :  { %1088 = vmatpush1.bf16.msra.mxu1 %v1087_v4  ;;  %v1063_v4 = vpack.c.bf16 %v350_v1, %v348_v0  ;;  %v834_v0 = vld [vmem:[%s1936_s6] ss:$0 sm:$0xff] }
  0x4d   :  { %1020 = vmatpush1.bf16.msra.mxu0 %v1019_v19  ;;  %1089 = vmatprep.subr.bf16.mxu1 %v1180_v7  ;;  %v537_v19 = vld [vmem:[%s1935_s5 + $0x88] sm:$0xff]  ;;  %v723_v1 = vld [vmem:[%s1939_s9] sm:$0xff] }
  0x4e   :  { %1022 = vmatprep.subr.bf16.mxu0 %v1021_v20  ;;  %v1102_v20 = vpack.c.bf16 %v537_v19, %v536_v18 }
  0x50   :  { %1091 = vmatpush1.bf16.msra.mxu1 %v1090_v8  ;;  %v354_v8 = vld [vmem:[%s1933_s3 + $0x2b0] sm:$0xff] }
  0x51   :  { %1024 = vmatpush1.bf16.msra.mxu0 %v1023_v25  ;;  %1092 = vmatprep.subr.bf16.mxu1 %v1180_v7  ;;  %v1696_v25 = vshrl.u32 %v96_v24, 7  ;;  %v1067_v12 = vpack.c.bf16 %v354_v8, %v352_v6  ;;  %v1075_v24 = vpack.c.bf16 %v362_v22, %v360_v21  ;;  %v1135_v6 = vpack.c.bf16 %v724_v2, %v723_v1  ;;  %v838_v21 = vld [vmem:[%s1940_s10] ss:$0 sm:$0xff] }
  0x52   :  { %1026 = vmatprep.subr.bf16.mxu0 %v1025_v26 }
  0x53   :  { %v98_v26 = vsub.s32 0, %v1696_v25  ;;  %v102_v28 = vsub.s32 1, %v1696_v25 }
  0x54   :  { %1094 = vmatpush1.bf16.msra.mxu1 %v1093_v11  ;;  %v106_v11 = vsub.s32 2, %v1696_v25  ;;  %v628_v25 = vld [vmem:[%s1937_s7 + $0x10] sm:$0xff] }
  0x55   :  { %1028 = vmatpush1.bf16.msra.mxu0 %v1027_v32  ;;  %1095 = vmatprep.subr.bf16.mxu1 %v1180_v7  ;;  %v99_v29 = vrot.slane %v1702_v27, %v98_v26  ;;  %v103_v31 = vrot.slane %v1702_v27, %v102_v28 }
  0x56   :  { %1030 = vmatprep.subr.bf16.mxu0 %v1029_v33  ;;  %v107_v18 = vrot.slane %v1702_v27, %v106_v11  ;;  %v540_v27 = vld [vmem:[%s1935_s5 + $0xa0] sm:$0xff]  ;;  %v1138_v11 = vpack.c.bf16 %v726_v10, %v725_v9 }
  0x58   :  { %1097 = vmatpush1.bf16.msra.mxu1 %v1096_v14  ;;  %v356_v14 = vld [vmem:[%s1933_s3 + $0x2c0] sm:$0xff] }
  0x59   :  { %1032 = vmatpush1.bf16.msra.mxu0 %v1031_v38  ;;  %1098 = vmatprep.subr.bf16.mxu1 %v1180_v7  ;;  %v337_v38 = vld [vmem:[%s1933_s3 + $0x228] sm:$0xff]  ;;  %v1071_v19 = vpack.c.bf16 %v358_v15, %v356_v14  ;;  %v730_v15 = vld [vmem:[%s1939_s9 + $0x38] sm:$0xf] }
  0x5a   :  { %1034 = vmatprep.subr.bf16.mxu0 %v1033_v39  ;;  %v339_v39 = vld [vmem:[%s1933_s3 + $0x238] sm:$0xff] }
  0x5b   :  { %v1049_v43 = vpack.c.bf16 %v339_v39, %v337_v38  ;;  %v373_v38 = vrot.slane %v364_v36, %v102_v28 }
  0x5c   :  { %1100 = vmatpush1.bf16.msra.mxu1 %v1099_v17  ;;  %v363_v17 = vld [vmem:[%s1933_s3 + $0x2f8] sm:$0xff] }
  0x5d   :  { %1036 = vmatpush1.bf16.msra.mxu0 %v1035_v44  ;;  %1101 = vmatprep.subr.bf16.mxu1 %v1180_v7  ;;  %v336_v44 = vld [vmem:[%s1933_s3 + $0x220] sm:$0xff] }
  0x5e   :  { %1038 = vmatprep.subr.bf16.mxu0 %v1037_v45  ;;  %v338_v45 = vld [vmem:[%s1933_s3 + $0x230] sm:$0xff] }
  0x60   :  { %1103 = vmatpush1.bf16.msra.mxu1 %v1102_v20  ;;  %v1073_v20 = vpack.c.bf16 %v363_v17, %v361_v16  ;;  %v836_v17 = vld [vmem:[%s1938_s8] ss:$0 sm:$0xff] }
  0x61   :  { %1040 = vmatpush1.bf16.msra.mxu0 %v1039_v48  ;;  %1104 = vmatprep.subr.bf16.mxu1 %v1180_v7  ;;  %v1051_v48 = vpack.c.bf16 %v338_v45, %v336_v44 }
  0x62   :  { %1042 = vmatprep.subr.bf16.mxu0 %v1041_v51  ;;  %v340_v51 = vld [vmem:[%s1933_s3 + $0x240] sm:$0xff] }
  0x63   :  { %v1055_v30 = vpack.c.bf16 %v342_v52, %v340_v51  ;;  %v632_v52 = vld [vmem:[%s1937_s7 + $0x30] sm:$0xff] }
  0x64   :  { %1106 = vmatpush1.bf16.msra.mxu1 %v1105_v23 }
  0x65   :  { %1044 = vmatpush1.bf16.msra.mxu0 %v1043_v54  ;;  %1107 = vmatprep.subr.bf16.mxu1 %v1180_v7  ;;  %v347_v54 = vld [vmem:[%s1933_s3 + $0x278] sm:$0xff] }
  0x66   :  { %1046 = vmatprep.subr.bf16.mxu0 %v1045_v56  ;;  %v1057_v57 = vpack.c.bf16 %v347_v54, %v345_v53  ;;  %v633_v53 = vld [vmem:[%s1937_s7 + $0x38] sm:$0xff] }
  0x67   :  { %v1123_v54 = vpack.c.bf16 %v633_v53, %v632_v52 }
  0xfb   :  { %v190_v32 = vpop.f32.mrb[0].mxu0 }
  0xfc   :  { %v191_v33 = vadd.f32 %v190_v32, %v99_v29  ;;  %v192_v34 = vpop.f32.mrb[1].mxu0 }
  0xfd   :  { %v193_v37 = vadd.f32 %v192_v34, %v103_v31  ;;  %v541_v31 = vld [vmem:[%s1935_s5 + $0xa8] sm:$0xff]  ;;  %v543_v34 = vld [vmem:[%s1935_s5 + $0xb8] sm:$0xff] }
  0xfe   :  { %v265_v42 = vmax.f32 %v191_v33, 0.0  ;;  %v1108_v32 = vpack.c.bf16 %v541_v31, %v540_v27  ;;  %v542_v33 = vld [vmem:[%s1935_s5 + $0xb0] sm:$0xff] }
  0xff   :  { %v266_v40 = vmax.f32 %v193_v37, 0.0  ;;  %v1111_v35 = vpack.c.bf16 %v543_v34, %v542_v33  ;;  %v369_v37 = vrot.slane %v364_v36, %v98_v26  ;;  %v629_v26 = vld [vmem:[%s1937_s7 + $0x18] sm:$0xff] }
 0x100   :  { %1109 = vmatpush1.bf16.msra.mxu1 %v1108_v32  ;;  %v1117_v28 = vpack.c.bf16 %v629_v26, %v628_v25 }
 0x101   :  { %440 = vmatprep.mubr.f32.mxu0 %v266_v40  ;;  %1110 = vmatprep.subr.bf16.mxu1 %v1180_v7 }
 0x102   :  { %441 = vmatmul.mubr.f32.vlgmr.msra.gmra.mrb[2].mxu0 %v265_v42  ;;  %v626_v42 = vld [vmem:[%s1937_s7] sm:$0xff] }
 0x103   :  { %1048 = vmatpush1.bf16.msra.mxu0 %v1047_v41  ;;  %511 = vmatprep.mubr.f32.mxu0 %v1181_v49 }
 0x104   :  { %1050 = vmatprep.subr.bf16.mxu0 %v1049_v43  ;;  %1112 = vmatpush1.bf16.msra.mxu1 %v1111_v35  ;;  %v627_v43 = vld [vmem:[%s1937_s7 + $0x8] sm:$0xff] }
 0x105   :  { %v261_v55 = vpop.f32.mrb[0].mxu1  ;;  %1113 = vmatprep.subr.bf16.mxu1 %v1180_v7  ;;  %v1114_v46 = vpack.c.bf16 %v627_v43, %v626_v42 }
 0x106   :  { %v263_v56 = vpop.f32.mrb[1].mxu1  ;;  %v262_v23 = vadd.f32 %v261_v55, %v107_v18  ;;  %v634_v55 = vld [vmem:[%s1937_s7 + $0x40] sm:$0xff] }
 0x107   :  { %1052 = vmatpush1.bf16.msra.mxu0 %v1051_v48  ;;  %v630_v48 = vld [vmem:[%s1937_s7 + $0x20] sm:$0xff] }
 0x108   :  { %1054 = vmatprep.subr.bf16.mxu0 %v1053_v50  ;;  %v267_v29 = vmax.f32 %v262_v23, 0.0  ;;  %v631_v50 = vld [vmem:[%s1937_s7 + $0x28] sm:$0xff] }
 0x109   :  { %v1120_v51 = vpack.c.bf16 %v631_v50, %v630_v48 }
 0x10b   :  { %1056 = vmatpush1.bf16.msra.mxu0 %v1055_v30  ;;  %v635_v30 = vld [vmem:[%s1937_s7 + $0x48] sm:$0xff] }
 0x10c   :  { %1058 = vmatprep.subr.bf16.mxu0 %v1057_v57  ;;  %v1126_v56 = vpack.c.bf16 %v635_v30, %v634_v55  ;;  %v636_v57 = vld [vmem:[%s1937_s7 + $0x50] sm:$0xff] }
 0x10d   :  { %v1129_v59 = vpack.c.bf16 %v637_v58, %v636_v57 }
 0x10f   :  { %1060 = vmatpush1.bf16.msra.mxu0 %v1059_v62  ;;  %v1132_v62 = vpack.c.bf16 %v639_v61, %v638_v60 }
 0x110   :  { %1062 = vmatprep.subr.bf16.mxu0 %v1061_v63  ;;  %v640_v63 = vld [vmem:[%s1937_s7 + $0x70] sm:$0xff] }
 0x113   :  { %1064 = vmatpush1.bf16.msra.mxu0 %v1063_v4 }
 0x114   :  { %1066 = vmatprep.subr.bf16.mxu0 %v1065_v5 }
 0x117   :  { %1068 = vmatpush1.bf16.msra.mxu0 %v1067_v12  ;;  %v727_v12 = vld [vmem:[%s1939_s9 + $0x20] sm:$0xff] }
 0x118   :  { %1070 = vmatprep.subr.bf16.mxu0 %v1069_v13  ;;  %v728_v13 = vld [vmem:[%s1939_s9 + $0x28] sm:$0xff] }
 0x119   :  { %v1141_v14 = vpack.c.bf16 %v728_v13, %v727_v12 }
 0x11b   :  { %1072 = vmatpush1.bf16.msra.mxu0 %v1071_v19 }
 0x11c   :  { %1074 = vmatprep.subr.bf16.mxu0 %v1073_v20 }
 0x11f   :  { %1076 = vmatpush1.bf16.msra.mxu0 %v1075_v24 }
 0x122   :  { %512 = vmatmul.mubr.f32.vlgmr.msra.gmra.mrb[2].mxu0 %v267_v29 }
 0x1f5   :  { %v513_v39 = vpop.f32.mrb[2].mxu0 }
 0x1f6   :  { %v1147_v40 = vadd.f32 %v513_v39, %v369_v37  ;;  %v515_v41 = vpop.f32.mrb[3].mxu0 }
 0x1f7   :  { %v1148_v44 = vadd.f32 %v515_v41, %v373_v38 }
 0x1f8   :  { %v518_v47 = vmax.f32 %v1147_v40, 0.0 }
 0x1f9   :  { %v519_v45 = vmax.f32 %v1148_v44, 0.0 }
 0x1fb   :  { %835 = vmatprep.mubr.msk.f32.mxu1 %vm551_vm1, %v519_v45 }
 0x1fc   :  { %620 = vmatmul.mubr.f32.vlgmr.msra.gmra.mrb[2].mxu1 %v518_v47 }
 0x1fd   :  { %1115 = vmatpush3.bf16.msra.mxu1 %v1114_v46  ;;  %896 = vmatprep.mubr.msk.f32.mxu1 %vm1182_vm2, %v1181_v49 }
 0x1fe   :  { %1116 = vmatprep.subr.bf16.mxu1 %v1180_v7 }
 0x201   :  { %1118 = vmatpush3.bf16.msra.mxu1 %v1117_v28 }
 0x202   :  { %1119 = vmatprep.subr.bf16.mxu1 %v1180_v7 }
 0x205   :  { %1121 = vmatpush3.bf16.msra.mxu1 %v1120_v51 }
 0x206   :  { %1122 = vmatprep.subr.bf16.mxu1 %v1180_v7 }
 0x209   :  { %1124 = vmatpush3.bf16.msra.mxu1 %v1123_v54 }
 0x20a   :  { %1125 = vmatprep.subr.bf16.mxu1 %v1180_v7 }
 0x20d   :  { %1127 = vmatpush3.bf16.msra.mxu1 %v1126_v56 }
 0x20e   :  { %1128 = vmatprep.subr.bf16.mxu1 %v1180_v7 }
 0x211   :  { %1130 = vmatpush3.bf16.msra.mxu1 %v1129_v59 }
 0x212   :  { %1131 = vmatprep.subr.bf16.mxu1 %v1180_v7 }
 0x215   :  { %1133 = vmatpush3.bf16.msra.mxu1 %v1132_v62 }
 0x216   :  { %894 = vmatprep.subr.mxu1 %v1181_v49 }
 0x219   :  { %895 = vmatpush3.msra.mxu1 %v640_v63 }
 0x21a   :  { %1134 = vmatprep.subr.bf16.mxu1 %v1180_v7 }
 0x2cf   :  { %v621_v3 = vpop.f32.mrb[2].mxu1 }
 0x2d0   :  { %v622_v4 = vadd.f32 %v834_v0, %v621_v3  ;;  %v623_v5 = vpop.f32.mrb[3].mxu1 }
 0x2d2   :  { %v625_v8 = vmax.f32 %v622_v4, 0.0 }
 0x2d4   :  { %897 = vmatmul.mubr.msk.f32.vlgmr.msra.gmra.mrb[4].mxu1 %vm648_vm3, %v625_v8 }
 0x2d5   :  { %1136 = vmatpush3.bf16.msra.mxu1 %v1135_v6  ;;  %915 = vmatprep.mubr.msk.f32.mxu1 %vm1182_vm2, %v1181_v49  ;;  %v729_v49 = vld [vmem:[%s1939_s9 + $0x30] sm:$0xff]  ;;  %s1184_s9 = smov [#allocation2]  }
 0x2d6   :  { %1137 = vmatprep.subr.bf16.mxu1 %v1180_v7  ;;  %v1144_v16 = vpack.c.bf16 %v730_v15, %v729_v49  ;;  %s823_s2 = sshll.u32 %s1184_s9, 4  ;;  %s824_s2 = int_to_ptr.vmem [resolvable:$true] %s823_s2 }
 0x2d7   :  { %s1156_s18 = scalar_lea.vmem %s824_s2, 32  ;;  %p1161_p1 = scmp.lt.s32.totalorder %s824_s2, %s824_s2 }
 0x2d8   :  { %p1157_p0 = scmp.ne.s32.totalorder %s824_s2, %s1156_s18  ;;  %p1162_p2 = scmp.lt.s32.totalorder %s1156_s18, %s1156_s18 }
 0x2d9   :  { %1139 = vmatpush3.bf16.msra.mxu1 %v1138_v11 }
 0x2da   :  { %1140 = vmatprep.subr.bf16.mxu1 %v1180_v7  ;;  %p1163_p3 = por %p1162_p2, %p1161_p1 }
 0x2dc   :  { %p1164_p4 = pnand %p1163_p3, %p1157_p0 }
 0x2dd   :  { %1142 = vmatpush3.bf16.msra.mxu1 %v1141_v14 }
 0x2de   :  { %1143 = vmatprep.subr.bf16.mxu1 %v1180_v7 }
 0x2e1   :  { %1146 = vmatpush3.bf16.msk.msra.mxu1 %vm1145_vm6, %v1144_v16 }
 0x3a7   :  { %v718_v18 = vpop.f32.mrb[4].mxu1 }
 0x3a8   :  { %v719_v19 = vadd.f32 %v836_v17, %v718_v18  ;;  %v898_v7 = vpop.f32.mrb[5].mxu1 }
 0x3aa   :  { %v722_v20 = vmax.f32 %v719_v19, 0.0 }
 0x3ac   :  { %916 = vmatmul.mubr.msk.f32.vlgmr.msra.gmra.mrb[6].mxu1 %vm738_vm7, %v722_v20 }
 0x47f   :  { %v812_v22 = vpop.f32.mrb[6].mxu1 }
 0x480   :  { %v813_v23 = vadd.f32 %v838_v21, %v812_v22  ;;  %v917_v24 = vpop.f32.mrb[7].mxu1 }
 0x482   :  { %816 = vst [vmem:[#allocation2] sm:$0x3] %v813_v23 }
 0x483   :  { %1167 = shalt.err (!%p1164_p4)
}
 0x484   :  { %s1168_s19 = scalar_lea.hbm %s1941_s11, 32 }
 0x485   :  { %p1169_p5 = scmp.ne.s32.totalorder %s1941_s11, %s1168_s19  ;;  %p1172_p6 = scmp.lt.u32.totalorder %s1168_s19, %s1941_s11 }
 0x487   :  { %p1174_p7 = pnand %p1172_p6, %p1169_p5 }
 0x489   :  { %1177 = shalt.err (!%p1174_p7)
}
 0x48a   :  { %826 = dma.vmem_to_hbm [thread:$0]  %s824_s2, 32, %s1941_s11, [#allocation3]  }
 0x48b   :  { %1178 = dma.done.wait [#allocation3], 32  }
 0x48c   :  { %1179 = vsyncadd [#allocation3], 4294967264 }
 0x48d   :  { %830 = vsyncpa [#allocation3], 1 }

</bundles_post_ra>
